<compile_context>
chip_gen: v5e
topology: v5e:2x2
jax: 0.10.0
libtpu: 0.0.40
codegen_flags: <defaults>
</compile_context>

<pallas_src>
import jax
import jax.numpy as jnp
from jax import lax
from jax.experimental import pallas as pl

LOG_SIG_MIN = -20.0      # rlkit TanhGaussianPolicy constants
LOG_SIG_MAX = 2.0
TANH_EPS = 1e-6          # rlkit TanhNormal epsilon
HALF_LOG_2PI = 0.5 * 1.8378770664093453  # 0.5 * log(2*pi)


# --------------------------------------------------------------------------
# Fused kernel: context encoder -> product of Gaussians -> rsample z ->
#               TanhGaussianPolicy forward (reparameterize=True, return_log_prob=True)
# --------------------------------------------------------------------------
def _make_pearl_kernel(T, N, B, L, A):
    TN = T * N
    M = T * B

    def kernel(ctx_ref, obs_ref,
               ew1_ref, eb1_ref, ew2_ref, eb2_ref, ew3_ref, eb3_ref,
               pw1o_ref, pw1z_ref, pb1_ref, pw2_ref, pb2_ref, pwh_ref, pbh_ref,
               epsz_ref, epsa_ref,
               enc_out_ref, pol_out_ref):
        f32 = jnp.float32

        # ---------------- context encoder MLP over all T*N rows -------------------
        x = ctx_ref[...]                                                     # (TN, C)
        h = jnp.maximum(
            jnp.dot(x, ew1_ref[...], preferred_element_type=f32) + eb1_ref[...], 0.0)
        h = jnp.maximum(
            jnp.dot(h, ew2_ref[...], preferred_element_type=f32) + eb2_ref[...], 0.0)
        head = jnp.dot(h, ew3_ref[...], preferred_element_type=f32) + eb3_ref[...]   # (TN, 2L)
        mu = head[:, :L]                                                     # (TN, L)
        sig2 = jnp.maximum(jax.nn.softplus(head[:, L:]), 1e-7)               # clamp(min=1e-7)
        inv = pl.reciprocal(sig2, approx=False)                              # 1 / sigma^2

        # _product_of_gaussians per task via a segment-sum matmul (no reshapes, no grid)
        col = lax.broadcasted_iota(jnp.int32, (T, TN), 1)
        lo = lax.broadcasted_iota(jnp.int32, (T, TN), 0) * N
        G = jnp.logical_and(col >= lo, col < lo + N).astype(f32)             # (T, TN)
        sum_inv = jnp.dot(G, inv, preferred_element_type=f32)                # (T, L)
        sum_mu_inv = jnp.dot(G, mu * inv, preferred_element_type=f32)        # (T, L)
        z_var = pl.reciprocal(sum_inv, approx=False)
        z_mean = z_var * sum_mu_inv
        z = z_mean + jnp.sqrt(z_var) * epsz_ref[...]                         # rsample, (T, L)

        # packed, lane-dense encoder stats: [z_means | z_vars | z]
        enc_out_ref[...] = jnp.concatenate([z_mean, z_var, z], axis=1)       # (T, 3L)

        # ---------------- TanhGaussianPolicy -------------------------------------
        obs = obs_ref[...]                                                   # (M, obs_dim)
        # broadcast z to the B rows of each task via a selection matmul
        # (replaces host-side repeat + concatenate of the policy input)
        mrow = lax.broadcasted_iota(jnp.int32, (M, T), 0)
        tlo = lax.broadcasted_iota(jnp.int32, (M, T), 1) * B
        S = jnp.logical_and(mrow >= tlo, mrow < tlo + B).astype(f32)         # (M, T)
        task_z = jnp.dot(S, z, preferred_element_type=f32)                   # (M, L)

        # first layer with split W1:  relu(obs @ W1_obs + task_z @ W1_z + b1)
        h = jnp.maximum(
            jnp.dot(obs, pw1o_ref[...], preferred_element_type=f32)
            + jnp.dot(task_z, pw1z_ref[...], preferred_element_type=f32)
            + pb1_ref[...], 0.0)
        h = jnp.maximum(
            jnp.dot(h, pw2_ref[...], preferred_element_type=f32) + pb2_ref[...], 0.0)
        heads = jnp.dot(h, pwh_ref[...], preferred_element_type=f32) + pbh_ref[...]  # (M, 2A)
        mean = heads[:, :A]
        log_std = jnp.clip(heads[:, A:], LOG_SIG_MIN, LOG_SIG_MAX)
        std = jnp.exp(log_std)

        eps = epsa_ref[...]                                                  # (M, A)
        pre = mean + std * eps                     # TanhNormal.rsample pre-tanh value
        action = jnp.tanh(pre)
        # Normal(mean, std).log_prob(pre); (pre - mean)/std == eps
        normal_lp = -0.5 * eps * eps - log_std - HALF_LOG_2PI
        lp_el = normal_lp - jnp.log(1.0 - action * action + TANH_EPS)
        log_prob = jnp.sum(lp_el, axis=-1, keepdims=True)                    # (M, 1)
        logp_b = jnp.broadcast_to(log_prob, (M, A))                          # lane-dense pack

        # packed, lane-dense policy output:
        # [action | mean | log_std | std | pre_tanh | log_prob(bcast) | task_z]
        pol_out_ref[...] = jnp.concatenate(
            [action, mean, log_std, std, pre, logp_b, task_z], axis=1)       # (M, 6A + L)

    return kernel


# --------------------------------------------------------------------------
# Host-side one-time weight re-layout (outside the hot path)
# --------------------------------------------------------------------------
def prepare_pearl_params(enc, pol):
    L = enc["w3m"].shape[1]
    obs_dim = pol["w1"].shape[0] - L
    return {
        "ew1": enc["w1"], "eb1": enc["b1"],
        "ew2": enc["w2"], "eb2": enc["b2"],
        "ew3": jnp.concatenate([enc["w3m"], enc["w3s"]], axis=1),   # fused mu/sigma head
        "eb3": jnp.concatenate([enc["b3m"], enc["b3s"]], axis=1),
        "pw1o": pol["w1"][:obs_dim, :],                             # split W1: obs part
        "pw1z": pol["w1"][obs_dim:, :],                             # split W1: z part
        "pb1": pol["b1"], "pw2": pol["w2"], "pb2": pol["b2"],
        "pwh": jnp.concatenate([pol["wm"], pol["ws"]], axis=1),     # fused mean/log_std head
        "pbh": jnp.concatenate([pol["bm"], pol["bs"]], axis=1),
    }


# --------------------------------------------------------------------------
# PEARLAgent.forward
# --------------------------------------------------------------------------
def pearl_agent_forward(obs, context, params, key):
    """Returns (policy_outputs, task_z, aux) like PEARLAgent.forward."""
    T, N, C = context.shape
    _, B, obs_dim = obs.shape
    L = params["ew3"].shape[1] // 2
    A = params["pwh"].shape[1] // 2
    M = T * B

    k_z, k_a = jax.random.split(key)
    # TODO(synk): eps could be drawn in-kernel with pltpu.prng_seed/prng_random_bits to
    # drop two host RNG ops + their HBM traffic; kept host-side for bitwise parity with
    # the pure-JAX reference check.
    eps_z = jax.random.normal(k_z, (T, L), dtype=jnp.float32)
    eps_a = jax.random.normal(k_a, (M, A), dtype=jnp.float32)

    kernel = _make_pearl_kernel(T, N, B, L, A)
    enc_out, pol_out = pl.pallas_call(
        kernel,
        out_shape=(jax.ShapeDtypeStruct((T, 3 * L), jnp.float32),
                   jax.ShapeDtypeStruct((M, 6 * A + L), jnp.float32)),
    )(context.reshape(T * N, C), obs.reshape(M, obs_dim),
      params["ew1"], params["eb1"], params["ew2"], params["eb2"],
      params["ew3"], params["eb3"],
      params["pw1o"], params["pw1z"], params["pb1"],
      params["pw2"], params["pb2"], params["pwh"], params["pbh"],
      eps_z, eps_a)

    # unpack (cheap host-side lane slices of the two lane-dense kernel outputs)
    z_means = enc_out[:, :L]
    z_vars = enc_out[:, L:2 * L]
    z = enc_out[:, 2 * L:]
    action = pol_out[:, 0 * A:1 * A]
    mean = pol_out[:, 1 * A:2 * A]
    log_std = pol_out[:, 2 * A:3 * A]
    std = pol_out[:, 3 * A:4 * A]
    pre = pol_out[:, 4 * A:5 * A]
    log_prob = pol_out[:, 5 * A:5 * A + 1]
    task_z = pol_out[:, 6 * A:]

    policy_outputs = (action, mean, log_std, log_prob, None, std, None, pre)
    aux = (z_means, z_vars, z, eps_z, eps_a)
    return policy_outputs, task_z, aux


# --------------------------------------------------------------------------
# Pure-JAX reference (original PEARLAgent math; correctness check only)
# --------------------------------------------------------------------------
def _ref_forward(obs, context, enc, pol, eps_z, eps_a):
    hi = jax.lax.Precision.HIGHEST
    T, N, C = context.shape
    _, B, obs_dim = obs.shape
    x = context.reshape(T * N, C)
    h = jax.nn.relu(jnp.dot(x, enc["w1"], precision=hi) + enc["b1"])
    h = jax.nn.relu(jnp.dot(h, enc["w2"], precision=hi) + enc["b2"])
    mu = (jnp.dot(h, enc["w3m"], precision=hi) + enc["b3m"]).reshape(T, N, -1)
    s2 = jax.nn.softplus(jnp.dot(h, enc["w3s"], precision=hi) + enc["b3s"]).reshape(T, N, -1)
    s2 = jnp.maximum(s2, 1e-7)
    var = 1.0 / jnp.sum(1.0 / s2, axis=1)
    mean = var * jnp.sum(mu / s2, axis=1)
    z = mean + jnp.sqrt(var) * eps_z
    task_z = jnp.repeat(z, B, axis=0)
    in_ = jnp.concatenate([obs.reshape(T * B, obs_dim), task_z], axis=1)
    h = jax.nn.relu(jnp.dot(in_, pol["w1"], precision=hi) + pol["b1"])
    h = jax.nn.relu(jnp.dot(h, pol["w2"], precision=hi) + pol["b2"])
    m = jnp.dot(h, pol["wm"], precision=hi) + pol["bm"]
    ls = jnp.clip(jnp.dot(h, pol["ws"], precision=hi) + pol["bs"], LOG_SIG_MIN, LOG_SIG_MAX)
    std = jnp.exp(ls)
    pre = m + std * eps_a
    act = jnp.tanh(pre)
    lp = (-0.5 * eps_a * eps_a - ls - HALF_LOG_2PI
          - jnp.log(1.0 - act * act + TANH_EPS)).sum(-1, keepdims=True)
    return act, m, ls, lp, std, pre, task_z, mean, var


# --------------------------------------------------------------------------
if __name__ == "__main__":
    # small shapes consistent with PEARLAgent
    T, N, B = 2, 8, 4           # tasks, context transitions per task, obs per task
    obs_dim, act_dim = 11, 4
    latent_dim = 8
    C = obs_dim + act_dim + 1   # (o, a, r) context feature
    H_ENC, H_POL = 32, 32

    key = jax.random.PRNGKey(0)
    keys = jax.random.split(key, 16)

    def init_w(k, shape, fan_in):
        return (jax.random.normal(k, shape, dtype=jnp.float32)
                / jnp.sqrt(fan_in)).astype(jnp.float32)

    # context encoder MLP: C -> H -> H -> {mu, sigma} heads
    enc = {
        "w1": init_w(keys[0], (C, H_ENC), C), "b1": jnp.zeros((1, H_ENC), jnp.float32),
        "w2": init_w(keys[1], (H_ENC, H_ENC), H_ENC), "b2": jnp.zeros((1, H_ENC), jnp.float32),
        "w3m": init_w(keys[2], (H_ENC, latent_dim), H_ENC),
        "b3m": jnp.zeros((1, latent_dim), jnp.float32),
        "w3s": init_w(keys[3], (H_ENC, latent_dim), H_ENC),
        "b3s": jnp.zeros((1, latent_dim), jnp.float32),
    }
    # TanhGaussianPolicy MLP: (obs_dim + latent) -> H -> H -> {mean, log_std}
    D_IN = obs_dim + latent_dim
    pol = {
        "w1": init_w(keys[4], (D_IN, H_POL), D_IN), "b1": jnp.zeros((1, H_POL), jnp.float32),
        "w2": init_w(keys[5], (H_POL, H_POL), H_POL), "b2": jnp.zeros((1, H_POL), jnp.float32),
        "wm": init_w(keys[6], (H_POL, act_dim), H_POL), "bm": jnp.zeros((1, act_dim), jnp.float32),
        "ws": init_w(keys[7], (H_POL, act_dim), H_POL), "bs": jnp.zeros((1, act_dim), jnp.float32),
    }

    obs = jax.random.normal(keys[8], (T, B, obs_dim), dtype=jnp.float32)
    context = jax.random.normal(keys[9], (T, N, C), dtype=jnp.float32)

    params = prepare_pearl_params(enc, pol)     # one-time weight re-layout
    policy_outputs, task_z, aux = pearl_agent_forward(obs, context, params, keys[10])
    action, mean, log_std, log_prob, _, std, _, pre = policy_outputs
    jax.block_until_ready((action, mean, log_std, log_prob, std, pre, task_z))

    # correctness check against a pure-JAX reference (same eps draws)
    z_means, z_vars, z, eps_z, eps_a = aux
    r_act, r_m, r_ls, r_lp, r_std, r_pre, r_tz, r_zm, r_zv = _ref_forward(
        obs, context, enc, pol, eps_z, eps_a)
    checks = [(action, r_act), (mean, r_m), (log_std, r_ls), (log_prob, r_lp),
              (std, r_std), (pre, r_pre), (task_z, r_tz),
              (z_means, r_zm), (z_vars, r_zv)]
    for got, ref in checks:
        assert jnp.allclose(got, ref, atol=1e-3, rtol=1e-3), "mismatch vs reference"

    print("KERNEL_OK")
</pallas_src>

<mosaic_0001>
module attributes {stable_mosaic.version = 11 : i64} {
  func.func @kernel(%arg0: memref<16x16xf32, #tpu.memory_space<vmem>>, %arg1: memref<8x11xf32, #tpu.memory_space<vmem>>, %arg2: memref<16x32xf32, #tpu.memory_space<vmem>>, %arg3: memref<1x32xf32, #tpu.memory_space<vmem>>, %arg4: memref<32x32xf32, #tpu.memory_space<vmem>>, %arg5: memref<1x32xf32, #tpu.memory_space<vmem>>, %arg6: memref<32x16xf32, #tpu.memory_space<vmem>>, %arg7: memref<1x16xf32, #tpu.memory_space<vmem>>, %arg8: memref<11x32xf32, #tpu.memory_space<vmem>>, %arg9: memref<8x32xf32, #tpu.memory_space<vmem>>, %arg10: memref<1x32xf32, #tpu.memory_space<vmem>>, %arg11: memref<32x32xf32, #tpu.memory_space<vmem>>, %arg12: memref<1x32xf32, #tpu.memory_space<vmem>>, %arg13: memref<32x8xf32, #tpu.memory_space<vmem>>, %arg14: memref<1x8xf32, #tpu.memory_space<vmem>>, %arg15: memref<2x8xf32, #tpu.memory_space<vmem>>, %arg16: memref<8x4xf32, #tpu.memory_space<vmem>>, %arg17: memref<2x24xf32, #tpu.memory_space<vmem>>, %arg18: memref<8x32xf32, #tpu.memory_space<vmem>>) attributes {dimension_semantics = [], scalar_prefetch = 0 : i64, scratch_operands = 0 : i64, tpu.core_type = #tpu.core_type<tc>} {
    %c0 = arith.constant 0 : index
    %c0_0 = arith.constant 0 : index
    %0 = vector.load %arg0[%c0, %c0_0] : memref<16x16xf32, #tpu.memory_space<vmem>>, vector<16x16xf32>
    %c0_1 = arith.constant 0 : index
    %c0_2 = arith.constant 0 : index
    %1 = vector.load %arg2[%c0_1, %c0_2] : memref<16x32xf32, #tpu.memory_space<vmem>>, vector<16x32xf32>
    %cst = arith.constant dense<0.000000e+00> : vector<16x32xf32>
    %2 = tpu.matmul %0, %1, %cst {dimension_numbers = #tpu.dot_dimension_numbers<[1], [0], [0], [1], [0, 0, 1, 1], [], []>} : vector<16x16xf32>, vector<16x32xf32>, vector<16x32xf32> -> vector<16x32xf32>
    %c0_3 = arith.constant 0 : index
    %c0_4 = arith.constant 0 : index
    %3 = vector.load %arg3[%c0_3, %c0_4] : memref<1x32xf32, #tpu.memory_space<vmem>>, vector<1x32xf32>
    %4 = vector.broadcast %3 : vector<1x32xf32> to vector<16x32xf32>
    %5 = arith.addf %2, %4 : vector<16x32xf32>
    %cst_5 = arith.constant 0.000000e+00 : f32
    %6 = vector.broadcast %cst_5 : f32 to vector<16x32xf32>
    %7 = arith.maximumf %5, %6 : vector<16x32xf32>
    %c0_6 = arith.constant 0 : index
    %c0_7 = arith.constant 0 : index
    %8 = vector.load %arg4[%c0_6, %c0_7] : memref<32x32xf32, #tpu.memory_space<vmem>>, vector<32x32xf32>
    %cst_8 = arith.constant dense<0.000000e+00> : vector<16x32xf32>
    %9 = tpu.matmul %7, %8, %cst_8 {dimension_numbers = #tpu.dot_dimension_numbers<[1], [0], [0], [1], [0, 0, 1, 1], [], []>} : vector<16x32xf32>, vector<32x32xf32>, vector<16x32xf32> -> vector<16x32xf32>
    %c0_9 = arith.constant 0 : index
    %c0_10 = arith.constant 0 : index
    %10 = vector.load %arg5[%c0_9, %c0_10] : memref<1x32xf32, #tpu.memory_space<vmem>>, vector<1x32xf32>
    %11 = vector.broadcast %10 : vector<1x32xf32> to vector<16x32xf32>
    %12 = arith.addf %9, %11 : vector<16x32xf32>
    %cst_11 = arith.constant 0.000000e+00 : f32
    %13 = vector.broadcast %cst_11 : f32 to vector<16x32xf32>
    %14 = arith.maximumf %12, %13 : vector<16x32xf32>
    %c0_12 = arith.constant 0 : index
    %c0_13 = arith.constant 0 : index
    %15 = vector.load %arg6[%c0_12, %c0_13] : memref<32x16xf32, #tpu.memory_space<vmem>>, vector<32x16xf32>
    %cst_14 = arith.constant dense<0.000000e+00> : vector<16x16xf32>
    %16 = tpu.matmul %14, %15, %cst_14 {dimension_numbers = #tpu.dot_dimension_numbers<[1], [0], [0], [1], [0, 0, 1, 1], [], []>} : vector<16x32xf32>, vector<32x16xf32>, vector<16x16xf32> -> vector<16x16xf32>
    %c0_15 = arith.constant 0 : index
    %c0_16 = arith.constant 0 : index
    %17 = vector.load %arg7[%c0_15, %c0_16] : memref<1x16xf32, #tpu.memory_space<vmem>>, vector<1x16xf32>
    %18 = vector.broadcast %17 : vector<1x16xf32> to vector<16x16xf32>
    %19 = arith.addf %16, %18 : vector<16x16xf32>
    %20 = vector.extract_strided_slice %19 {offsets = [0, 0], sizes = [16, 8], strides = [1, 1]} : vector<16x16xf32> to vector<16x8xf32>
    %21 = vector.extract_strided_slice %19 {offsets = [0, 8], sizes = [16, 8], strides = [1, 1]} : vector<16x16xf32> to vector<16x8xf32>
    %cst_17 = arith.constant 0.000000e+00 : f32
    %22 = vector.broadcast %cst_17 : f32 to vector<16x8xf32>
    %23 = arith.maximumf %21, %22 : vector<16x8xf32>
    %24 = vector.broadcast %cst_17 : f32 to vector<16x8xf32>
    %25 = arith.subf %21, %24 : vector<16x8xf32>
    %26 = arith.cmpf one, %25, %25 : vector<16x8xf32>
    %27 = vector.broadcast %cst_17 : f32 to vector<16x8xf32>
    %28 = arith.addf %21, %27 : vector<16x8xf32>
    %29 = math.absf %25 : vector<16x8xf32>
    %cst_18 = arith.constant 0.000000e+00 : f32
    %30 = vector.broadcast %cst_18 : f32 to vector<16x8xf32>
    %31 = arith.subf %30, %29 : vector<16x8xf32>
    %32 = math.exp %31 : vector<16x8xf32>
    %33 = math.log1p %32 : vector<16x8xf32>
    %34 = arith.addf %23, %33 : vector<16x8xf32>
    %35 = arith.select %26, %28, %34 : vector<16x8xi1>, vector<16x8xf32>
    %cst_19 = arith.constant 1.000000e-07 : f32
    %36 = vector.broadcast %cst_19 : f32 to vector<16x8xf32>
    %37 = arith.maximumf %35, %36 : vector<16x8xf32>
    %38 = tpu.reciprocal %37 : vector<16x8xf32> -> vector<16x8xf32>
    %39 = tpu.iota {dimensions = array<i32: 1>} : vector<2x16xi32>
    %40 = tpu.iota {dimensions = array<i32: 0>} : vector<2x16xi32>
    %c8_i32 = arith.constant 8 : i32
    %41 = vector.broadcast %c8_i32 : i32 to vector<2x16xi32>
    %42 = arith.muli %40, %41 : vector<2x16xi32>
    %43 = arith.cmpi sge, %39, %42 : vector<2x16xi32>
    %c8_i32_20 = arith.constant 8 : i32
    %44 = vector.broadcast %c8_i32_20 : i32 to vector<2x16xi32>
    %45 = arith.addi %42, %44 : vector<2x16xi32>
    %46 = arith.cmpi slt, %39, %45 : vector<2x16xi32>
    %47 = arith.andi %43, %46 : vector<2x16xi1>
    %48 = arith.extui %47 : vector<2x16xi1> to vector<2x16xi32>
    %49 = arith.sitofp %48 : vector<2x16xi32> to vector<2x16xf32>
    %cst_21 = arith.constant dense<0.000000e+00> : vector<2x8xf32>
    %50 = tpu.matmul %49, %38, %cst_21 {dimension_numbers = #tpu.dot_dimension_numbers<[1], [0], [0], [1], [0, 0, 1, 1], [], []>} : vector<2x16xf32>, vector<16x8xf32>, vector<2x8xf32> -> vector<2x8xf32>
    %51 = arith.mulf %20, %38 : vector<16x8xf32>
    %cst_22 = arith.constant dense<0.000000e+00> : vector<2x8xf32>
    %52 = tpu.matmul %49, %51, %cst_22 {dimension_numbers = #tpu.dot_dimension_numbers<[1], [0], [0], [1], [0, 0, 1, 1], [], []>} : vector<2x16xf32>, vector<16x8xf32>, vector<2x8xf32> -> vector<2x8xf32>
    %53 = tpu.reciprocal %50 : vector<2x8xf32> -> vector<2x8xf32>
    %54 = arith.mulf %53, %52 : vector<2x8xf32>
    %55 = math.sqrt %53 : vector<2x8xf32>
    %c0_23 = arith.constant 0 : index
    %c0_24 = arith.constant 0 : index
    %56 = vector.load %arg15[%c0_23, %c0_24] : memref<2x8xf32, #tpu.memory_space<vmem>>, vector<2x8xf32>
    %57 = arith.mulf %55, %56 : vector<2x8xf32>
    %58 = arith.addf %54, %57 : vector<2x8xf32>
    %59 = tpu.concatenate %54, %53, %58 in 1 : vector<2x8xf32>, vector<2x8xf32>, vector<2x8xf32> -> vector<2x24xf32>
    %c0_25 = arith.constant 0 : index
    %c0_26 = arith.constant 0 : index
    %60 = vector.load %arg17[%c0_25, %c0_26] : memref<2x24xf32, #tpu.memory_space<vmem>>, vector<2x24xf32>
    tpu.vector_store %arg17[%c0_25, %c0_26], %59 {strides = array<i32>} : memref<2x24xf32, #tpu.memory_space<vmem>>, vector<2x24xf32>,
    %c0_27 = arith.constant 0 : index
    %c0_28 = arith.constant 0 : index
    %61 = vector.load %arg1[%c0_27, %c0_28] : memref<8x11xf32, #tpu.memory_space<vmem>>, vector<8x11xf32>
    %62 = tpu.iota {dimensions = array<i32: 0>} : vector<8x2xi32>
    %63 = tpu.iota {dimensions = array<i32: 1>} : vector<8x2xi32>
    %c4_i32 = arith.constant 4 : i32
    %64 = vector.broadcast %c4_i32 : i32 to vector<8x2xi32>
    %65 = arith.muli %63, %64 : vector<8x2xi32>
    %66 = arith.cmpi sge, %62, %65 : vector<8x2xi32>
    %c4_i32_29 = arith.constant 4 : i32
    %67 = vector.broadcast %c4_i32_29 : i32 to vector<8x2xi32>
    %68 = arith.addi %65, %67 : vector<8x2xi32>
    %69 = arith.cmpi slt, %62, %68 : vector<8x2xi32>
    %70 = arith.andi %66, %69 : vector<8x2xi1>
    %71 = arith.extui %70 : vector<8x2xi1> to vector<8x2xi32>
    %72 = arith.sitofp %71 : vector<8x2xi32> to vector<8x2xf32>
    %cst_30 = arith.constant dense<0.000000e+00> : vector<8x8xf32>
    %73 = tpu.matmul %72, %58, %cst_30 {dimension_numbers = #tpu.dot_dimension_numbers<[1], [0], [0], [1], [0, 0, 1, 1], [], []>} : vector<8x2xf32>, vector<2x8xf32>, vector<8x8xf32> -> vector<8x8xf32>
    %c0_31 = arith.constant 0 : index
    %c0_32 = arith.constant 0 : index
    %74 = vector.load %arg8[%c0_31, %c0_32] : memref<11x32xf32, #tpu.memory_space<vmem>>, vector<11x32xf32>
    %cst_33 = arith.constant dense<0.000000e+00> : vector<8x32xf32>
    %75 = tpu.matmul %61, %74, %cst_33 {dimension_numbers = #tpu.dot_dimension_numbers<[1], [0], [0], [1], [0, 0, 1, 1], [], []>} : vector<8x11xf32>, vector<11x32xf32>, vector<8x32xf32> -> vector<8x32xf32>
    %c0_34 = arith.constant 0 : index
    %c0_35 = arith.constant 0 : index
    %76 = vector.load %arg9[%c0_34, %c0_35] : memref<8x32xf32, #tpu.memory_space<vmem>>, vector<8x32xf32>
    %cst_36 = arith.constant dense<0.000000e+00> : vector<8x32xf32>
    %77 = tpu.matmul %73, %76, %cst_36 {dimension_numbers = #tpu.dot_dimension_numbers<[1], [0], [0], [1], [0, 0, 1, 1], [], []>} : vector<8x8xf32>, vector<8x32xf32>, vector<8x32xf32> -> vector<8x32xf32>
    %78 = arith.addf %75, %77 : vector<8x32xf32>
    %c0_37 = arith.constant 0 : index
    %c0_38 = arith.constant 0 : index
    %79 = vector.load %arg10[%c0_37, %c0_38] : memref<1x32xf32, #tpu.memory_space<vmem>>, vector<1x32xf32>
    %80 = vector.broadcast %79 : vector<1x32xf32> to vector<8x32xf32>
    %81 = arith.addf %78, %80 : vector<8x32xf32>
    %cst_39 = arith.constant 0.000000e+00 : f32
    %82 = vector.broadcast %cst_39 : f32 to vector<8x32xf32>
    %83 = arith.maximumf %81, %82 : vector<8x32xf32>
    %c0_40 = arith.constant 0 : index
    %c0_41 = arith.constant 0 : index
    %84 = vector.load %arg11[%c0_40, %c0_41] : memref<32x32xf32, #tpu.memory_space<vmem>>, vector<32x32xf32>
    %cst_42 = arith.constant dense<0.000000e+00> : vector<8x32xf32>
    %85 = tpu.matmul %83, %84, %cst_42 {dimension_numbers = #tpu.dot_dimension_numbers<[1], [0], [0], [1], [0, 0, 1, 1], [], []>} : vector<8x32xf32>, vector<32x32xf32>, vector<8x32xf32> -> vector<8x32xf32>
    %c0_43 = arith.constant 0 : index
    %c0_44 = arith.constant 0 : index
    %86 = vector.load %arg12[%c0_43, %c0_44] : memref<1x32xf32, #tpu.memory_space<vmem>>, vector<1x32xf32>
    %87 = vector.broadcast %86 : vector<1x32xf32> to vector<8x32xf32>
    %88 = arith.addf %85, %87 : vector<8x32xf32>
    %cst_45 = arith.constant 0.000000e+00 : f32
    %89 = vector.broadcast %cst_45 : f32 to vector<8x32xf32>
    %90 = arith.maximumf %88, %89 : vector<8x32xf32>
    %c0_46 = arith.constant 0 : index
    %c0_47 = arith.constant 0 : index
    %91 = vector.load %arg13[%c0_46, %c0_47] : memref<32x8xf32, #tpu.memory_space<vmem>>, vector<32x8xf32>
    %cst_48 = arith.constant dense<0.000000e+00> : vector<8x8xf32>
    %92 = tpu.matmul %90, %91, %cst_48 {dimension_numbers = #tpu.dot_dimension_numbers<[1], [0], [0], [1], [0, 0, 1, 1], [], []>} : vector<8x32xf32>, vector<32x8xf32>, vector<8x8xf32> -> vector<8x8xf32>
    %c0_49 = arith.constant 0 : index
    %c0_50 = arith.constant 0 : index
    %93 = vector.load %arg14[%c0_49, %c0_50] : memref<1x8xf32, #tpu.memory_space<vmem>>, vector<1x8xf32>
    %94 = vector.broadcast %93 : vector<1x8xf32> to vector<8x8xf32>
    %95 = arith.addf %92, %94 : vector<8x8xf32>
    %96 = vector.extract_strided_slice %95 {offsets = [0, 0], sizes = [8, 4], strides = [1, 1]} : vector<8x8xf32> to vector<8x4xf32>
    %97 = vector.extract_strided_slice %95 {offsets = [0, 4], sizes = [8, 4], strides = [1, 1]} : vector<8x8xf32> to vector<8x4xf32>
    %cst_51 = arith.constant -2.000000e+01 : f32
    %cst_52 = arith.constant 2.000000e+00 : f32
    %98 = vector.broadcast %cst_51 : f32 to vector<8x4xf32>
    %99 = arith.maximumf %98, %97 : vector<8x4xf32>
    %100 = vector.broadcast %cst_52 : f32 to vector<8x4xf32>
    %101 = arith.minimumf %100, %99 : vector<8x4xf32>
    %102 = math.exp %101 : vector<8x4xf32>
    %c0_53 = arith.constant 0 : index
    %c0_54 = arith.constant 0 : index
    %103 = vector.load %arg16[%c0_53, %c0_54] : memref<8x4xf32, #tpu.memory_space<vmem>>, vector<8x4xf32>
    %104 = arith.mulf %102, %103 : vector<8x4xf32>
    %105 = arith.addf %96, %104 : vector<8x4xf32>
    %106 = math.tanh %105 : vector<8x4xf32>
    %cst_55 = arith.constant -5.000000e-01 : f32
    %107 = vector.broadcast %cst_55 : f32 to vector<8x4xf32>
    %108 = arith.mulf %107, %103 : vector<8x4xf32>
    %109 = arith.mulf %108, %103 : vector<8x4xf32>
    %110 = arith.subf %109, %101 : vector<8x4xf32>
    %cst_56 = arith.constant 0.918938517 : f32
    %111 = vector.broadcast %cst_56 : f32 to vector<8x4xf32>
    %112 = arith.subf %110, %111 : vector<8x4xf32>
    %113 = arith.mulf %106, %106 : vector<8x4xf32>
    %cst_57 = arith.constant 1.000000e+00 : f32
    %114 = vector.broadcast %cst_57 : f32 to vector<8x4xf32>
    %115 = arith.subf %114, %113 : vector<8x4xf32>
    %cst_58 = arith.constant 9.99999997E-7 : f32
    %116 = vector.broadcast %cst_58 : f32 to vector<8x4xf32>
    %117 = arith.addf %115, %116 : vector<8x4xf32>
    %118 = math.log %117 : vector<8x4xf32>
    %119 = arith.subf %112, %118 : vector<8x4xf32>
    %cst_59 = arith.constant dense<0.000000e+00> : vector<8xf32>
    %120 = vector.multi_reduction <add>, %119, %cst_59 [1] : vector<8x4xf32> to vector<8xf32>
    %121 = vector.shape_cast %120 : vector<8xf32> to vector<8x1xf32>
    %122 = vector.shape_cast %121 : vector<8x1xf32> to vector<8x1xf32>
    %123 = vector.broadcast %122 : vector<8x1xf32> to vector<8x4xf32>
    %124 = tpu.concatenate %106, %96, %101, %102, %105, %123, %73 in 1 : vector<8x4xf32>, vector<8x4xf32>, vector<8x4xf32>, vector<8x4xf32>, vector<8x4xf32>, vector<8x4xf32>, vector<8x8xf32> -> vector<8x32xf32>
    %c0_60 = arith.constant 0 : index
    %c0_61 = arith.constant 0 : index
    %125 = vector.load %arg18[%c0_60, %c0_61] : memref<8x32xf32, #tpu.memory_space<vmem>>, vector<8x32xf32>
    tpu.vector_store %arg18[%c0_60, %c0_61], %124 {strides = array<i32>} : memref<8x32xf32, #tpu.memory_space<vmem>>, vector<8x32xf32>,
    return
  }
}

</mosaic_0001>

<bundles_post_ra>
// kernel: tpu_custom_call.1
= control target key start
LH: loop header
LB: loop body
LE: loop exit
PB: predicated region body
PF: predicated region fallthrough
CT: control target
= control target key end

     0   :  { %s1304_s0 = inlined_call_operand.vmem [shape: f32[16,16], index: 0, kind: input, shape index: {}]   ;;  %s1305_s1 = inlined_call_operand.hbm [shape: f32[8,11], index: 1, kind: input, shape index: {}]   ;;  %s1306_s2 = inlined_call_operand.hbm [shape: f32[16,32], index: 2, kind: input, shape index: {}]   ;;  %s1307_s3 = inlined_call_operand.hbm [shape: f32[1,32], index: 3, kind: input, shape index: {}]   ;;  %s1308_s4 = inlined_call_operand.vmem [shape: f32[32,32], index: 4, kind: input, shape index: {}]   ;;  %s1309_s5 = inlined_call_operand.hbm [shape: f32[1,32], index: 5, kind: input, shape index: {}]   ;;  %s1310_s6 = inlined_call_operand.vmem [shape: f32[32,16], index: 6, kind: input, shape index: {}]   ;;  %s1311_s7 = inlined_call_operand.hbm [shape: f32[1,16], index: 7, kind: input, shape index: {}]   ;;  %s1312_s8 = inlined_call_operand.hbm [shape: f32[11,32], index: 8, kind: input, shape index: {}]   ;;  %s1313_s9 = inlined_call_operand.hbm [shape: f32[8,32], index: 9, kind: input, shape index: {}]   ;;  %s1314_s10 = inlined_call_operand.vmem [shape: f32[1,32], index: 10, kind: input, shape index: {}]   ;;  %s1315_s11 = inlined_call_operand.vmem [shape: f32[32,32], index: 11, kind: input, shape index: {}]   ;;  %s1316_s12 = inlined_call_operand.hbm [shape: f32[1,32], index: 12, kind: input, shape index: {}]   ;;  %s1317_s13 = inlined_call_operand.vmem [shape: f32[32,8], index: 13, kind: input, shape index: {}]   ;;  %s1318_s14 = inlined_call_operand.vmem [shape: f32[1,8], index: 14, kind: input, shape index: {}]   ;;  %s1319_s15 = inlined_call_operand.vmem [shape: f32[2,8], index: 15, kind: input, shape index: {}]   ;;  %s1320_s16 = inlined_call_operand.vmem [shape: f32[8,4], index: 16, kind: input, shape index: {}]   ;;  %s1321_s17 = inlined_call_operand.hbm [shape: f32[2,24], index: 17, kind: output, shape index: {0}]   ;;  %s1322_s18 = inlined_call_operand.hbm [shape: f32[8,32], index: 18, kind: output, shape index: {1}]  }
   0x1   :  { %1324 = sst [smem:[#allocation26_spill]] %s1304_s0 }
   0x2   :  { %1325 = sst [smem:[#allocation27_spill]] %s1305_s1 }
   0x3   :  { %1326 = sst [smem:[#allocation28_spill]] %s1306_s2 }
   0x4   :  { %1327 = sst [smem:[#allocation29_spill]] %s1322_s18 }
   0x5   :  { %24 = vsyncpa [#allocation3], 0 }
   0x6   :  { %25 = vsyncpa [#allocation6], 0 }
   0x7   :  { %26 = vsyncpa [#allocation9], 0 }
   0x8   :  { %27 = vsyncpa [#allocation12], 0 }
   0x9   :  { %28 = vsyncpa [#allocation15], 0 }
   0xa   :  { %29 = vsyncpa [#allocation4], 0  ;;  %s1328_s29 = sld [smem:[#allocation28_spill]] }
  0x10   :  { %s48_s30 = sshll.u32 %s1328_s29, 4  ;;  %s49_s30 = int_to_ptr.hbm [resolvable:$true] %s48_s30 }
  0x11   :  { %30 = vsyncpa [#allocation18], 0  ;;  %s1038_s0 = smov [#allocation5]   ;;  %s75_s21 = sshll.u32 %s1309_s5, 4  ;;  %s76_s21 = int_to_ptr.hbm [resolvable:$true] %s75_s21 }
  0x12   :  { %s50_s19 = sshll.u32 %s1038_s0, 4  ;;  %s1039_s22 = smov 128   ;;  %s51_s19 = int_to_ptr.vmem [resolvable:$true] %s50_s19 }
  0x13   :  { %s1040_s2 = smov 8   ;;  %s1041_s23 = smov [#allocation8]  }
  0x14   :  { %56 = dma.hbm_to_vmem [thread:$0]  %s49_s30, 256, %s51_s19, [#allocation6], %s1039_s22, %s1039_s22, %s1040_s2  }
  0x15   :  { %s77_s24 = sshll.u32 %s1041_s23, 4  ;;  %s98_s27 = sshll.u32 %s1312_s8, 4  ;;  %s78_s24 = int_to_ptr.vmem [resolvable:$true] %s77_s24  ;;  %s99_s27 = int_to_ptr.hbm [resolvable:$true] %s98_s27 }
  0x16   :  { %80 = dma.hbm_to_vmem [thread:$0]  %s76_s21, 16, %s78_s24, [#allocation9]  }
  0x17   :  { %s1329_s0 = sld [smem:[#allocation27_spill]]  ;;  %s1042_s1 = smov [#allocation11]  }
  0x18   :  { %s100_s5 = sshll.u32 %s1042_s1, 4  ;;  %s1043_s30 = smov [#allocation2]   ;;  %s101_s5 = int_to_ptr.vmem [resolvable:$true] %s100_s5 }
  0x19   :  { %106 = dma.hbm_to_vmem [thread:$0]  %s99_s27, 256, %s101_s5, [#allocation12], %s1039_s22, %s1039_s22, %s1040_s2  }
  0x1a   :  { %s40_s19 = sshll.u32 %s1043_s30, 4  ;;  %s62_s25 = sshll.u32 %s1307_s3, 4  ;;  %s41_s19 = int_to_ptr.vmem [resolvable:$true] %s40_s19  ;;  %s63_s25 = int_to_ptr.hbm [resolvable:$true] %s62_s25 }
  0x1b   :  { %s88_s24 = sshll.u32 %s1311_s7, 4  ;;  %s1044_s26 = smov [#allocation7]   ;;  %s89_s24 = int_to_ptr.hbm [resolvable:$true] %s88_s24 }
  0x1c   :  { %s64_s28 = sshll.u32 %s1044_s26, 4  ;;  %s1045_s29 = smov [#allocation10]   ;;  %s65_s28 = int_to_ptr.vmem [resolvable:$true] %s64_s28 }
  0x1d   :  { %s38_s18 = sshll.u32 %s1329_s0, 4  ;;  %s90_s22 = sshll.u32 %s1045_s29, 4  ;;  %s39_s18 = int_to_ptr.hbm [resolvable:$true] %s38_s18  ;;  %s91_s22 = int_to_ptr.vmem [resolvable:$true] %s90_s22 }
  0x1e   :  { %43 = dma.hbm_to_vmem [thread:$0]  %s39_s18, 128, %s41_s19, [#allocation3]  }
  0x1f   :  { %67 = dma.hbm_to_vmem [thread:$0]  %s63_s25, 16, %s65_s28, [#allocation6]  }
  0x20   :  { %s112_s1 = sshll.u32 %s1313_s9, 4  ;;  %s127_s5 = sshll.u32 %s1316_s12, 4  ;;  %s113_s1 = int_to_ptr.hbm [resolvable:$true] %s112_s1  ;;  %s128_s5 = int_to_ptr.hbm [resolvable:$true] %s127_s5 }
  0x21   :  { %93 = dma.hbm_to_vmem [thread:$0]  %s89_s24, 16, %s91_s22, [#allocation9]  }
  0x22   :  { %s1046_s30 = smov [#allocation13]   ;;  %s1047_s19 = smov [#allocation14]  }
  0x23   :  { %s114_s7 = sshll.u32 %s1046_s30, 4  ;;  %s129_s20 = sshll.u32 %s1047_s19, 4  ;;  %s115_s7 = int_to_ptr.vmem [resolvable:$true] %s114_s7  ;;  %s130_s20 = int_to_ptr.vmem [resolvable:$true] %s129_s20 }
  0x24   :  { %117 = dma.hbm_to_vmem [thread:$0]  %s113_s1, 128, %s115_s7, [#allocation12]  }
  0x25   :  { %132 = dma.hbm_to_vmem [thread:$0]  %s128_s5, 16, %s130_s20, [#allocation15]  }
  0x26   :  { %1024 = dma.done.wait [#allocation3], 128  }
  0x27   :  { %1025 = vsyncadd [#allocation3], 4294967168 }
  0x28   :  { %1026 = dma.done.wait [#allocation6], 272  }
  0x29   :  { %1027 = vsyncadd [#allocation6], 4294967024 }
  0x2a   :  { %1028 = dma.done.wait [#allocation9], 32  }
  0x2b   :  { %1029 = vsyncadd [#allocation9], 4294967264 }
  0x2c   :  { %1030 = dma.done.wait [#allocation12], 384  }
  0x2d   :  { %1031 = vsyncadd [#allocation12], 4294966912 }
  0x2e   :  { %1032 = dma.done.wait [#allocation15], 16  }
  0x2f   :  { %1033 = vsyncadd [#allocation15], 4294967280  ;;  %v176_v0 = vld [vmem:[#allocation5 + $0x8] sm:$0xff]  ;;  %v175_v1 = vld [vmem:[#allocation5] sm:$0xff]  ;;  %s1330_s23 = sld [smem:[#allocation26_spill]]  ;;  %vm181_vm0 = vcmask 130048  }
  0x30   :  { %202 = vmatpush.msra.mxu0 %v176_v0  ;;  %v216_v3 = vld [vmem:[%s1308_s4 + $0x18] sm:$0xff]  ;;  %v215_v5 = vld [vmem:[%s1308_s4 + $0x10] sm:$0xff]  ;;  %v214_v6 = vld [vmem:[%s1308_s4 + $0x8] sm:$0xff]  ;;  %vm221_vm1 = vcmask 261120   ;;  %s1050_s30 = smov 4   ;;  %s1055_s12 = smov [#allocation17]  }
  0x31   :  { %240 = vmatpush.msra.mxu1 %v216_v3  ;;  %v213_v7 = vld [vmem:[%s1308_s4] sm:$0xff]  ;;  %v256_v8 = vld [vmem:[%s1310_s6 + $0x18] sm:$0xff]  ;;  %v255_v16 = vld [vmem:[%s1310_s6 + $0x10] sm:$0xff] }
  0x32   :  { %203 = vmatpush.msra.mxu0 %v175_v1  ;;  %279 = vmatpush.msra.mxu2 %v256_v8  ;;  %v756_v9 = vld [vmem:[#allocation7] ss:$0 sm:$0xff]  ;;  %v254_v17 = vld [vmem:[%s1310_s6 + $0x8] sm:$0xff]  ;;  %v253_v18 = vld [vmem:[%s1310_s6] sm:$0xff]  ;;  %s1048_s6 = smov 120  }
  0x33   :  { %241 = vmatpush.msra.mxu1 %v215_v5  ;;  %v757_v19 = vld [vmem:[#allocation8] ss:$0 sm:$0xff]  ;;  %v758_v26 = vld [vmem:[#allocation10] ss:$0 sm:$0xff] }
  0x34   :  { %280 = vmatpush.msra.mxu2 %v255_v16 }
  0x35   :  { %v173_v2 = vld [vmem:[%s1330_s23] sm:$0xff]  ;;  %v174_v4 = vld [vmem:[%s1330_s23 + $0x8] sm:$0xff]  ;;  %242 = vmatpush.msra.mxu1 %v214_v6  ;;  %s699_s23 = sshll.u32 %s1055_s12, 4  ;;  %s700_s23 = int_to_ptr.vmem [resolvable:$true] %s699_s23 }
  0x36   :  { %720 = vmatmul.msk.f32.vlgmr.msra.gmra.mxu0 %vm181_vm0, %v173_v2  ;;  %281 = vmatpush.msra.mxu2 %v254_v17 }
  0x37   :  { %243 = vmatpush.msra.mxu1 %v213_v7 }
  0x38   :  { %282 = vmatpush.msra.mxu2 %v253_v18 }
  0x3e   :  { %721 = vmatmul.msk.f32.gmra.mxu0 %vm181_vm0, %v174_v4 }
  0xb3   :  { %v205_v10 = vpop.f32.mrf.mxu0 }
  0xb4   :  { %v206_v11 = vadd.f32 %v756_v9, %v205_v10 }
  0xb6   :  { %v211_v12 = vmax.f32 %v206_v11, 0.0 }
  0xb8   :  { %722 = vmatmul.msk.f32.vlgmr.msra.gmra.mxu1 %vm221_vm1, %v211_v12 }
  0xbb   :  { %v208_v13 = vpop.f32.mrf.mxu0 }
  0xbc   :  { %v209_v14 = vadd.f32 %v756_v9, %v208_v13 }
  0xbe   :  { %v212_v15 = vmax.f32 %v209_v14, 0.0 }
  0xc0   :  { %723 = vmatmul.msk.f32.gmra.mxu1 %vm221_vm1, %v212_v15 }
 0x135   :  { %v245_v20 = vpop.f32.mrf.mxu1 }
 0x136   :  { %v246_v21 = vadd.f32 %v757_v19, %v245_v20 }
 0x138   :  { %v251_v22 = vmax.f32 %v246_v21, 0.0 }
 0x13a   :  { %724 = vmatmul.msk.f32.vlgmr.msra.gmra.mxu2 %vm221_vm1, %v251_v22 }
 0x13d   :  { %v248_v23 = vpop.f32.mrf.mxu1 }
 0x13e   :  { %v249_v24 = vadd.f32 %v757_v19, %v248_v23  ;;  %v356_v19 = vlaneseq }
 0x140   :  { %v252_v25 = vmax.f32 %v249_v24, 0.0  ;;  %v359_v20 = vshrl.u32 %v356_v19, 7  ;;  %v357_v22 = vand.u32 127, %v356_v19  ;;  %v761_v19 = vld [vmem:[%s1318_s14] ss:$0 sm:$0xff]  ;;  %s1052_s14 = smov 24  }
 0x142   :  { %725 = vmatmul.msk.f32.gmra.mxu2 %vm221_vm1, %v252_v25  ;;  %v360_v21 = vmul.u32 8, %v359_v20  ;;  %v1049_v25 = vmov 0.0  }
 0x144   :  { %v362_v23 = vadd.s32 8, %v360_v21  ;;  %vm361_vm14 = vcmp.ge.s32.totalorder %v357_v22, %v360_v21 }
 0x146   :  { %vm363_vm15 = vcmp.lt.s32.totalorder %v357_v22, %v362_v23 }
 0x1bd   :  { %v284_v27 = vpop.f32.mrf.mxu2 }
 0x1be   :  { %v1213_v28 = vadd.f32 %v758_v26, %v284_v27 }
 0x1c0   :  { %v296_v29 = vand.u32 2147483647, %v1213_v28  ;;  %v290_v48 = vmax.f32 %v1213_v28, 0.0  ;;  %vm292_vm3 = vcmp.ne.f32.partialorder %v1213_v28, %v1213_v28 }
 0x1c2   :  { %v298_v30 = vsub.f32 0.0, %v296_v29 }
 0x1c4   :  { %v300_v31 = vmul.f32 1.442695, %v298_v30 }
 0x1c5   :  { %v287_v32 = vpop.f32.mrf.mxu2 }
 0x1c6   :  { %762 = vpow2.f32 %v300_v31  ;;  %v1216_v33 = vadd.f32 %v758_v26, %v287_v32 }
 0x1c8   :  { %v297_v34 = vand.u32 2147483647, %v1216_v33  ;;  %v291_v58 = vmax.f32 %v1216_v33, 0.0  ;;  %vm293_vm5 = vcmp.ne.f32.partialorder %v1216_v33, %v1216_v33 }
 0x1ca   :  { %v299_v35 = vsub.f32 0.0, %v297_v34 }
 0x1cc   :  { %v763_v36 = vpop.eup %762  ;;  %v302_v37 = vmul.f32 1.442695, %v299_v35 }
 0x1cd   :  { %v304_v38 = vadd.f32 1.0, %v763_v36  ;;  %v307_v39 = vmul.f32 -0.5, %v763_v36  ;;  %v310_v41 = vand.u32 2147483647, %v763_v36 }
 0x1ce   :  { %764 = vpow2.f32 %v302_v37 }
 0x1cf   :  { %766 = vlog2.f32 %v304_v38  ;;  %v308_v40 = vadd.f32 1.0, %v307_v39  ;;  %vm311_vm2 = vcmp.lt.f32.partialorder %v310_v41, 0.0004427343 }
 0x1d1   :  { %v309_v46 = vmul.f32 %v763_v36, %v308_v40 }
 0x1d4   :  { %v765_v42 = vpop.eup %764 }
 0x1d5   :  { %v767_v43 = vpop.eup %766  ;;  %v313_v44 = vadd.f32 1.0, %v765_v42  ;;  %v316_v47 = vmul.f32 -0.5, %v765_v42  ;;  %v319_v53 = vand.u32 2147483647, %v765_v42 }
 0x1d6   :  { %v306_v45 = vmul.f32 0.6931472, %v767_v43 }
 0x1d7   :  { %768 = vlog2.f32 %v313_v44  ;;  %v317_v51 = vadd.f32 1.0, %v316_v47  ;;  %vm320_vm4 = vcmp.lt.f32.partialorder %v319_v53, 0.0004427343  ;;  %v464_v44 = vmul.u32 4, %v357_v22 }
 0x1d8   :  { %v312_v49 = vsel %vm311_vm2, %v309_v46, %v306_v45  ;;  %vm364_vm2 = vmand %vm361_vm14, %vm363_vm15  ;;  %vm528_vm14 = vcmask 1042432   ;;  %vm524_vm15 = vcmask 89088  }
 0x1d9   :  { %v322_v50 = vadd.f32 %v312_v49, %v290_v48  ;;  %v318_v57 = vmul.f32 %v765_v42, %v317_v51  ;;  %v726_v26 = vsel %vm364_vm2, 1.0, %v1049_v25  ;;  %v466_v47 = vadd.s32 4, %v464_v44 }
 0x1da   :  { %vm458_vm2 = vcmask 64512  }
 0x1db   :  { %v324_v52 = vsel %vm292_vm3, %v1213_v28, %v322_v50 }
 0x1dc   :  { %v326_v55 = vmax.f32 %v324_v52, 1e-07  ;;  %v447_v52 = vld [vmem:[%s1319_s15] sm:$0x3]  ;;  %s690_s15 = sshll.u32 %s1321_s17, 4  ;;  %s1331_s17 = sld [smem:[#allocation29_spill]]  ;;  %s691_s15 = int_to_ptr.hbm [resolvable:$true] %s690_s15 }
 0x1dd   :  { %v769_v54 = vpop.eup %768 }
 0x1de   :  { %v315_v56 = vmul.f32 0.6931472, %v769_v54  ;;  %770 = vrcp.f32 %v326_v55  ;;  %v339_v14 = vand.u32 2147483648, %v326_v55  ;;  %vm333_vm11 = vweird.f32 %v326_v55 }
 0x1df   :  { %v337_v15 = vand.u32 2147483647, %v326_v55 }
 0x1e0   :  { %v321_v59 = vsel %vm320_vm4, %v318_v57, %v315_v56  ;;  %v340_v17 = vor.u32 1.1754944e-38, %v339_v14  ;;  %v625_v14 = vld [vmem:[%s1320_s16] sm:$0xff]  ;;  %s1053_s16 = smov 16  }
 0x1e1   :  { %v323_v60 = vadd.f32 %v321_v59, %v291_v58  ;;  %vm338_vm13 = vcmp.eq.f32.partialorder %v337_v15, 8.507059e+37  ;;  %v500_v59 = vld [vmem:[#allocation13] sm:$0xff]  ;;  %627 = vrot.lane.b32.xlu1 %v625_v14, %s1050_s30  ;;  %v760_v15 = vld [vmem:[#allocation14] ss:$0 sm:$0xff] }
 0x1e2   :  { %s701_s21 = sshll.u32 %s1331_s17, 4  ;;  %s702_s21 = int_to_ptr.hbm [resolvable:$true] %s701_s21 }
 0x1e3   :  { %v325_v61 = vsel %vm293_vm5, %v1216_v33, %v323_v60  ;;  %v499_v60 = vld [vmem:[#allocation11 + $0x8] sm:$0x7] }
 0x1e4   :  { %v327_v62 = vmax.f32 %v325_v61, 1e-07  ;;  %v771_v63 = vpop.eup %770  ;;  %v498_v61 = vld [vmem:[#allocation11] sm:$0xff]  ;;  %733 = vmatpush.msk.msrb.mxu1 %vm528_vm14, %v499_v60 }
 0x1e5   :  { %v329_v0 = vmul.f32 %v771_v63, %v326_v55  ;;  %vm334_vm10 = vweird.f32 %v771_v63 }
 0x1e6   :  { %772 = vrcp.f32 %v327_v62  ;;  %v353_v5 = vand.u32 2147483648, %v327_v62  ;;  %v351_v7 = vand.u32 2147483647, %v327_v62  ;;  %vm347_vm7 = vweird.f32 %v327_v62  ;;  %vm335_vm12 = vmor %vm333_vm11, %vm334_vm10  ;;  %547 = vmatpush.msrb.mxu1 %v498_v61 }
 0x1e7   :  { %v330_v4 = vsub.f32 1.0, %v329_v0  ;;  %v561_v0 = vld [vmem:[%s1315_s11 + $0x18] sm:$0xff] }
 0x1e8   :  { %v354_v10 = vor.u32 1.1754944e-38, %v353_v5  ;;  %vm352_vm9 = vcmp.eq.f32.partialorder %v351_v7, 8.507059e+37  ;;  %581 = vmatpush.msrb.mxu2 %v561_v0 }
 0x1e9   :  { %v331_v9 = vmul.f32 %v771_v63, %v330_v4  ;;  %v593_v4 = vld [vmem:[%s1317_s13 + $0x18] sm:$0xff] }
 0x1eb   :  { %v332_v13 = vadd.f32 %v771_v63, %v331_v9 }
 0x1ec   :  { %v773_v1 = vpop.eup %772 }
 0x1ed   :  { %v343_v2 = vmul.f32 %v773_v1, %v327_v62  ;;  %vm348_vm6 = vweird.f32 %v773_v1  ;;  %v336_v16 = vsel %vm335_vm12, %v771_v63, %v332_v13  ;;  %vm475_vm12 = vcmask 1041408   ;;  %v463_v62 = vld [vmem:[#allocation2] sm:$0xff] }
 0x1ee   :  { %vm349_vm8 = vmor %vm347_vm7, %vm348_vm6  ;;  %v341_v18 = vsel %vm338_vm13, %v340_v17, %v336_v16  ;;  %vm465_vm7 = vcmp.ge.s32.totalorder %v359_v20, %v464_v44  ;;  %vm471_vm13 = vcmask 15360   ;;  %734 = vmatmul.msk.f32.vlgmr.msrb.gmra.mxu1 %vm524_vm15, %v463_v62  ;;  %v590_v13 = vld [vmem:[%s1317_s13] sm:$0xff] }
 0x1ef   :  { %v344_v3 = vsub.f32 1.0, %v343_v2  ;;  %v559_v2 = vld [vmem:[%s1315_s11 + $0x8] sm:$0xff] }
 0x1f1   :  { %v345_v6 = vmul.f32 %v773_v1, %v344_v3  ;;  %v558_v3 = vld [vmem:[%s1315_s11] sm:$0xff] }
 0x1f3   :  { %v346_v8 = vadd.f32 %v773_v1, %v345_v6  ;;  %v759_v6 = vld [vmem:[%s1314_s10] ss:$0 sm:$0xff] }
 0x1f5   :  { %v350_v11 = vsel %vm349_vm8, %v773_v1, %v346_v8  ;;  %vm467_vm8 = vcmp.lt.s32.totalorder %v359_v20, %v466_v47  ;;  %v560_v1 = vld [vmem:[%s1315_s11 + $0x10] sm:$0xff] }
 0x1f6   :  { %v355_v12 = vsel %vm352_vm9, %v354_v10, %v350_v11  ;;  %vm468_vm11 = vmand %vm465_vm7, %vm467_vm8  ;;  %582 = vmatpush.msrb.mxu2 %v560_v1  ;;  %v592_v11 = vld [vmem:[%s1317_s13 + $0x10] sm:$0xff]  ;;  %vm680_vm7 = vcmask 195584  }
 0x1f7   :  { %371 = vrot.lane.b32.xlu0 %v355_v12, %s1048_s6  ;;  %v729_v58 = vsel %vm468_vm11, 1.0, %v1049_v25  ;;  %v591_v12 = vld [vmem:[%s1317_s13 + $0x8] sm:$0xff]  ;;  %s1051_s13 = smov 124  }
 0x1f8   :  { %583 = vmatpush.msrb.mxu2 %v559_v2 }
 0x1fa   :  { %584 = vmatpush.msrb.mxu2 %v558_v3 }
 0x1ff   :  { %369 = vrot.lane.b32.xlu0 %v341_v18, %s1048_s6 }
 0x253   :  { %v628_v25 = vpop.permute.xlu1 %627 }
 0x269   :  { %v372_v24 = vpop.permute.xlu0 %371 }
 0x26a   :  { %392 = vmatpush.msra.mxu3 %v372_v24  ;;  %v399_v29 = vmul.f32 %v372_v24, %v1216_v33 }
 0x26b   :  { %v549_v5 = vpop.f32.mrf.mxu1 }
 0x271   :  { %v370_v27 = vpop.permute.xlu0 %369 }
 0x272   :  { %393 = vmatpush.msra.mxu3 %v370_v27  ;;  %v398_v30 = vmul.f32 %v370_v27, %v1213_v28 }
 0x273   :  { %727 = vmatmul.msk.f32.vlgmr.msra.gmra.mxu3 %vm181_vm0, %v726_v26 }
 0x274   :  { %414 = vmatpush.msrb.mxu3 %v399_v29 }
 0x276   :  { %415 = vmatpush.msrb.mxu3 %v398_v30 }
 0x278   :  { %519 = vmatpush.msra.mxu3 %v500_v59 }
 0x27b   :  { %728 = vmatmul.msk.f32.vlgmr.msrb.gmra.mxu3 %vm181_vm0, %v726_v26 }
 0x2f6   :  { %v395_v31 = vpop.f32.mrf.mxu3 }
 0x2f7   :  { %774 = vrcp.f32 %v395_v31  ;;  %v431_v36 = vand.u32 2147483648, %v395_v31  ;;  %v429_v38 = vand.u32 2147483647, %v395_v31  ;;  %vm425_vm4 = vweird.f32 %v395_v31 }
 0x2f9   :  { %v432_v33 = vor.u32 1.1754944e-38, %v431_v36  ;;  %vm430_vm6 = vcmp.eq.f32.partialorder %v429_v38, 8.507059e+37 }
 0x2fd   :  { %v775_v32 = vpop.eup %774 }
 0x2fe   :  { %v421_v34 = vmul.f32 %v775_v32, %v395_v31  ;;  %vm426_vm3 = vweird.f32 %v775_v32  ;;  %v417_v50 = vpop.f32.mrf.mxu3 }
 0x2ff   :  { %vm427_vm5 = vmor %vm425_vm4, %vm426_vm3  ;;  %vm651_vm3 = vcmask 31744   ;;  %vm461_vm4 = vcmask 189440  }
 0x300   :  { %v422_v35 = vsub.f32 1.0, %v421_v34 }
 0x302   :  { %v423_v37 = vmul.f32 %v775_v32, %v422_v35 }
 0x304   :  { %v424_v39 = vadd.f32 %v775_v32, %v423_v37  ;;  %v637_v37 = vmul.f32 -0.5, %v625_v14 }
 0x306   :  { %v428_v28 = vsel %vm427_vm5, %v775_v32, %v424_v39  ;;  %vm675_vm5 = vcmask 97280  }
 0x307   :  { %v1231_v40 = vsel %vm430_vm6, %v432_v33, %v428_v28  ;;  %v638_v33 = vmul.f32 %v637_v37, %v625_v14  ;;  %vm678_vm6 = vcmask 162816  }
 0x308   :  { %776 = vrsqrt.f32 %v1231_v40  ;;  %vm442_vm9 = vcmp.eq.f32.partialorder %v1231_v40, inf  ;;  %v445_v51 = vand.u32 2147483648, %v1231_v40  ;;  %vm444_vm10 = vcmp.eq.f32.partialorder %v1231_v40, 0.0 }
 0x309   :  { %v1244_v55 = vmul.f32 %v1231_v40, %v417_v50 }
 0x30e   :  { %v777_v41 = vpop.eup %776 }
 0x30f   :  { %v436_v42 = vmul.f32 %v777_v41, %v1231_v40 }
 0x311   :  { %v437_v43 = vmul.f32 %v777_v41, %v436_v42 }
 0x313   :  { %v438_v45 = vmul.f32 0.5, %v437_v43 }
 0x315   :  { %v439_v46 = vsub.f32 1.5, %v438_v45 }
 0x317   :  { %v440_v48 = vmul.f32 %v777_v41, %v439_v46 }
 0x319   :  { %v441_v49 = vmul.f32 %v440_v48, %v1231_v40 }
 0x31b   :  { %v443_v53 = vsel %vm442_vm9, %v1231_v40, %v441_v49 }
 0x31c   :  { %v446_v54 = vsel %vm444_vm10, %v445_v51, %v443_v53 }
 0x31d   :  { %v448_v56 = vmul.f32 %v447_v52, %v446_v54 }
 0x31f   :  { %v1247_v57 = vadd.f32 %v448_v56, %v1244_v55 }
 0x321   :  { %730 = vmatpush.msk.msrb.mxu0 %vm475_vm12, %v1247_v57 }
 0x322   :  { %731 = vmatmul.msk.f32.vlgmr.msrb.gmra.mxu0 %vm471_vm13, %v729_v58 }
 0x323   :  { %613 = vmatpush.msra.mxu0 %v593_v4 }
 0x325   :  { %614 = vmatpush.msra.mxu0 %v592_v11 }
 0x327   :  { %615 = vmatpush.msra.mxu0 %v591_v12 }
 0x329   :  { %616 = vmatpush.msra.mxu0 %v590_v13 }
 0x39f   :  { %v495_v63 = vpop.f32.mrf.mxu0 }
 0x3a0   :  { %732 = vmatmul.msk.f32.vlgmr.msra.gmra.mxu3 %vm458_vm2, %v495_v63 }
 0x423   :  { %v521_v7 = vpop.f32.mrf.mxu3 }
 0x424   :  { %v550_v8 = vadd.f32 %v549_v5, %v521_v7 }
 0x426   :  { %v556_v9 = vadd.f32 %v759_v6, %v550_v8 }
 0x428   :  { %v557_v10 = vmax.f32 %v556_v9, 0.0 }
 0x42a   :  { %735 = vmatmul.msk.f32.vlgmr.msrb.gmra.mxu2 %vm221_vm1, %v557_v10 }
 0x4ad   :  { %v586_v16 = vpop.f32.mrf.mxu2 }
 0x4ae   :  { %v587_v17 = vadd.f32 %v760_v15, %v586_v16 }
 0x4b0   :  { %v589_v18 = vmax.f32 %v587_v17, 0.0 }
 0x4b2   :  { %736 = vmatmul.msk.f32.vlgmr.msra.gmra.mxu0 %vm221_vm1, %v589_v18 }
 0x52f   :  { %v618_v20 = vpop.f32.mrf.mxu0 }
 0x530   :  { %v619_v21 = vadd.f32 %v761_v19, %v618_v20 }
 0x532   :  { %v621_v22 = vmax.f32 %v619_v21, -20.0 }
 0x534   :  { %v622_v23 = vmin.f32 %v621_v22, 2.0 }
 0x536   :  { %640 = vrot.lane.b32.xlu2 %v622_v23, %s1051_s13  ;;  %v623_v24 = vmul.f32 1.442695, %v622_v23  ;;  %659 = vrot.lane.b32.xlu0 %v622_v23, %s1050_s30 }
 0x538   :  { %778 = vpow2.f32 %v623_v24 }
 0x53e   :  { %v779_v26 = vpop.eup %778  ;;  %656 = vrot.lane.b32.xlu2 %v619_v21, %s1050_s30 }
 0x53f   :  { %v630_v27 = vmul.f32 %v779_v26, %v628_v25 }
 0x541   :  { %632 = vrot.lane.b32.xlu1 %v630_v27, %s1051_s13 }
 0x549   :  { %663 = vrot.lane.b32.xlu1 %v779_v26, %s1040_s2 }
 0x551   :  { %451 = vrot.lane.b32.xlu1 %v1231_v40, %s1040_s2  ;;  %s1054_s2 = smov [#allocation16]  }
 0x552   :  { %s688_s6 = sshll.u32 %s1054_s2, 4  ;;  %s689_s6 = int_to_ptr.vmem [resolvable:$true] %s688_s6 }
 0x559   :  { %670 = vrot.lane.b32.xlu1 %v495_v63, %s1052_s14 }
 0x590   :  { %v641_v29 = vpop.permute.xlu2 %640 }
 0x591   :  { %v643_v28 = vsub.f32 %v638_v33, %v641_v29 }
 0x593   :  { %v737_v41 = vadd.f32 -0.9189385, %v643_v28 }
 0x598   :  { %v657_v34 = vpop.permute.xlu2 %656 }
 0x5a8   :  { %v660_v45 = vpop.permute.xlu0 %659 }
 0x5b3   :  { %v633_v30 = vpop.permute.xlu1 %632 }
 0x5b4   :  { %v635_v31 = vadd.f32 %v633_v30, %v619_v21 }
 0x5b6   :  { %780 = vtanh.f32 %v635_v31  ;;  %667 = vrot.lane.b32.xlu0 %v635_v31, %s1053_s16 }
 0x5bb   :  { %v664_v46 = vpop.permute.xlu1 %663 }
 0x5bc   :  { %v781_v32 = vpop.eup %780 }
 0x5bd   :  { %v645_v35 = vmul.f32 %v781_v32, %v781_v32  ;;  %v673_v36 = vsel %vm651_vm3, %v781_v32, %v657_v34 }
 0x5be   :  { %455 = vrot.lane.b32.xlu0 %v1247_v57, %s1053_s16  ;;  %v674_v52 = vsel %vm458_vm2, %v673_v36, %v660_v45 }
 0x5bf   :  { %v646_v38 = vsub.f32 1.0, %v645_v35  ;;  %v676_v53 = vsel %vm675_vm5, %v674_v52, %v664_v46 }
 0x5c1   :  { %v647_v39 = vadd.f32 1e-06, %v646_v38 }
 0x5c3   :  { %782 = vlog2.f32 %v647_v39  ;;  %v452_v48 = vpop.permute.xlu1 %451 }
 0x5c4   :  { %v459_v49 = vsel %vm458_vm2, %v1244_v55, %v452_v48 }
 0x5c9   :  { %v783_v40 = vpop.eup %782 }
 0x5ca   :  { %v649_v42 = vmul.f32 0.6931472, %v783_v40 }
 0x5cb   :  { %v671_v56 = vpop.permute.xlu1 %670 }
 0x5cc   :  { %v650_v43 = vsub.f32 %v737_v41, %v649_v42 }
 0x5ce   :  { %v652_v44 = vsel %vm651_vm3, %v650_v43, 0.0 }
 0x5cf   :  { %653 = vadd.xlane.f32.xlu2 %v652_v44 }
 0x628   :  { %v668_v47 = vpop.permute.xlu0 %667 }
 0x629   :  { %v677_v54 = vsel %vm181_vm0, %v676_v53, %v668_v47 }
 0x630   :  { %v456_v50 = vpop.permute.xlu0 %455 }
 0x631   :  { %v460_v51 = vsel %vm181_vm0, %v459_v49, %v456_v50 }
 0x632   :  { %462 = vst.msk [vmem:[#allocation16] sm:$0x3] %vm461_vm4, %v460_v51 }
 0x633   :  { %693 = dma.vmem_to_hbm [thread:$0]  %s689_s6, 32, %s691_s15, [#allocation4]  }
 0x642   :  { %v654_v55 = vpop.xlane.xlu2 %653 }
 0x643   :  { %v679_v57 = vsel %vm678_vm6, %v677_v54, %v654_v55 }
 0x644   :  { %v681_v58 = vsel %vm680_vm7, %v679_v57, %v671_v56 }
 0x645   :  { %682 = vst.msk [vmem:[#allocation17] sm:$0xff] %vm221_vm1, %v681_v58 }
 0x646   :  { %704 = dma.vmem_to_hbm [thread:$0]  %s700_s23, 128, %s702_s21, [#allocation18]  }
 0x647   :  { %1034 = dma.done.wait [#allocation4], 32  }
 0x648   :  { %1035 = vsyncadd [#allocation4], 4294967264 }
 0x649   :  { %1036 = dma.done.wait [#allocation18], 128  }
 0x64a   :  { %1037 = vsyncadd [#allocation18], 4294967168 }
 0x64b   :  { %713 = vsyncpa [#allocation3], 1 }
 0x64c   :  { %714 = vsyncpa [#allocation6], 1 }
 0x64d   :  { %715 = vsyncpa [#allocation9], 1 }
 0x64e   :  { %716 = vsyncpa [#allocation12], 1 }
 0x64f   :  { %717 = vsyncpa [#allocation15], 1 }
 0x650   :  { %718 = vsyncpa [#allocation4], 1 }
 0x651   :  { %719 = vsyncpa [#allocation18], 1 }

</bundles_post_ra>
